<compile_context>
chip_gen: v7x
topology: tpu7x:2x2x1
jax: 0.10.0
libtpu: 0.0.40
codegen_flags: <defaults>
</compile_context>

<pallas_src>
import functools

import jax
import jax.numpy as jnp
from jax.experimental import pallas as pl
from jax.experimental.pallas import tpu as pltpu


def _round_up(x: int, m: int) -> int:
    return ((x + m - 1) // m) * m


def dense_block_kernel(x_ref, w_ref, b_ref, out_ref, *, cin: int, cout: int, fold: int):
    x = x_ref[...]                                            # (tm, fold*Cin), storage dtype
    # Single fused matmul for both causal convs of all folded sub-rows
    # (block-diagonal weight when fold > 1).  f32 accumulation on the MXU.
    y = jnp.dot(x, w_ref[...], preferred_element_type=jnp.float32) + b_ref[...]
    pieces = []
    for r in range(fold):
        xr = x[:, r * cin:(r + 1) * cin]
        yr = y[:, r * 2 * cout:(r + 1) * 2 * cout]
        # Gate math in f32 (v5e has no bf16 VPU/EUP); tanh/sigmoid go to the EUP.
        act = jnp.tanh(yr[:, :cout]) * jax.nn.sigmoid(yr[:, cout:])
        pieces.append(xr.astype(out_ref.dtype))
        pieces.append(act.astype(out_ref.dtype))
    # Assemble the full output tile in registers and do ONE full-width store
    # (unmasked vst when the folded width is a multiple of 128 lanes).
    out_ref[...] = jnp.concatenate(pieces, axis=1)


def prepare_dense_block_params(wf, bf, wg, bg):
    """One-time PyTorch -> kernel layout transform (do at parameter-load time).

    wf/wg: (Cout, Cin, 2) Conv1d weights; bf/bg: (Cout,).
    Keeps only kernel tap 1 (tap 0 always multiplies the zero left-padding for
    a length-1 sequence with dilation >= 1) and fuses both convs into a single
    (Cin, 2*Cout) weight and (1, 2*Cout) bias.
    """
    w_fused = jnp.concatenate([wf[:, :, 1].T, wg[:, :, 1].T], axis=1)   # (Cin, 2*Cout)
    b_fused = jnp.concatenate([bf, bg]).reshape(1, -1)                  # (1, 2*Cout)
    return w_fused, b_fused


def dense_block(x, w_fused, b_fused, *, dilation: int = 1, block_rows: int = 4096):
    """x: (N, Cin); w_fused: (Cin, 2*Cout); b_fused: (1, 2*Cout).

    Storage dtype follows the inputs (use bf16 on v6e/v7x for ~2x on this
    HBM-bound kernel); accumulation and gate math are f32.
    """
    # Tap-0-is-zero simplification requires at least one zero of left padding.
    assert dilation >= 1, "DenseBlock kernel assumes dilation >= 1"

    n, cin = x.shape
    cout2 = w_fused.shape[1]
    assert cout2 % 2 == 0
    cout = cout2 // 2
    width = cin + cout

    # Lane-dense fold: pack `fold` logical rows into one 128-lane physical row
    # when shapes allow (row-major reshape -> free, no HBM copy).
    fold = 1
    if width < 128 and 128 % width == 0:
        f_try = 128 // width
        if n % f_try == 0:
            fold = f_try

    if fold > 1:
        x_in = x.reshape(n // fold, fold * cin)                       # free bitcast
        w_in = jnp.kron(jnp.eye(fold, dtype=w_fused.dtype), w_fused)  # block-diag (fold*Cin, fold*2*Cout)
        b_in = jnp.tile(b_fused, (1, fold))                           # (1, fold*2*Cout)
    else:
        x_in, w_in, b_in = x, w_fused, b_fused

    n_rows = n // fold

    # Row tile: big enough to amortize the ~0.35us/step overhead, multiple of 8
    # (sublane), and chosen so the grid has >= 2 steps whenever rows allow it
    # (v7x megacore sharding of the "parallel" axis).  No padding: the ragged
    # tail block is handled by Pallas (OOB output rows are never written).
    tm = min(block_rows, _round_up(pl.cdiv(n_rows, 2), 8))
    grid = (pl.cdiv(n_rows, tm),)

    kernel = functools.partial(dense_block_kernel, cin=cin, cout=cout, fold=fold)

    out = pl.pallas_call(
        kernel,
        out_shape=jax.ShapeDtypeStruct((n_rows, fold * width), x.dtype),
        grid=grid,
        in_specs=[
            pl.BlockSpec((tm, fold * cin), lambda i: (i, 0)),                # x: tiled over rows
            pl.BlockSpec((fold * cin, fold * 2 * cout), lambda i: (0, 0)),   # weights: VMEM-resident
            pl.BlockSpec((1, fold * 2 * cout), lambda i: (0, 0)),            # bias: VMEM-resident
        ],
        out_specs=pl.BlockSpec((tm, fold * width), lambda i: (i, 0)),
        compiler_params=pltpu.CompilerParams(
            dimension_semantics=("parallel",),            # megacore split on v7x
        ),
    )(x_in, w_in, b_in)

    return out.reshape(n, width) if fold > 1 else out


def _reference(x, wf, bf, wg, bg):
    """Plain-JAX reference of the exact PyTorch forward (pad+conv, length-1 seq)."""
    xf = x @ wf[:, :, 1].T + bf
    xg = x @ wg[:, :, 1].T + bg
    return jnp.concatenate([x, jnp.tanh(xf) * jax.nn.sigmoid(xg)], axis=1)


def _run_case(key, n, in_filters, out_filters, dilation):
    k1, k2, k3, k4, k5 = jax.random.split(key, 5)
    x = jax.random.normal(k1, (n, in_filters), jnp.float32)
    # Deterministic synthetic parameters, PyTorch Conv1d layout (out, in, kernel=2).
    wf = 0.1 * jax.random.normal(k2, (out_filters, in_filters, 2), jnp.float32)
    bf = 0.1 * jax.random.normal(k3, (out_filters,), jnp.float32)
    wg = 0.1 * jax.random.normal(k4, (out_filters, in_filters, 2), jnp.float32)
    bg = 0.1 * jax.random.normal(k5, (out_filters,), jnp.float32)

    w_fused, b_fused = prepare_dense_block_params(wf, bf, wg, bg)
    out = jax.block_until_ready(dense_block(x, w_fused, b_fused, dilation=dilation))

    ref = _reference(x, wf, bf, wg, bg)
    assert out.shape == (n, in_filters + out_filters), out.shape
    err = float(jnp.abs(out - ref).max())
    assert jnp.allclose(out, ref, atol=1e-5, rtol=1e-5), err


if __name__ == "__main__":
    root = jax.random.PRNGKey(0)
    ka, kb = jax.random.split(root)

    # Case 1: default module config (Cin=Cout=32) -> lane-dense fold path (fold=2).
    _run_case(ka, n=8, in_filters=32, out_filters=32, dilation=2)

    # Case 2: ragged N (not divisible by fold or tile) -> fallback path, no pad/slice.
    _run_case(kb, n=7, in_filters=32, out_filters=32, dilation=1)

    print("KERNEL_OK")
</pallas_src>

<mosaic_0001>
module attributes {stable_mosaic.version = 11 : i64} {
  func.func @dense_block_kernel(%arg0: i32, %arg1: memref<8x64xf32, #tpu.memory_space<vmem>>, %arg2: memref<64x128xf32, #tpu.memory_space<vmem>>, %arg3: memref<1x128xf32, #tpu.memory_space<vmem>>, %arg4: memref<8x128xf32, #tpu.memory_space<vmem>>) attributes {dimension_semantics = [#tpu.dimension_semantics<parallel>], iteration_bounds = array<i64: 1>, scalar_prefetch = 0 : i64, scratch_operands = 0 : i64, tpu.core_type = #tpu.core_type<tc>, window_params = [{transform_indices = @transform_0, window_bounds = array<i64: 8, 64>}, {pipeline_mode = #tpu.pipeline_mode<synchronous>, transform_indices = @transform_1, window_bounds = array<i64: 64, 128>}, {pipeline_mode = #tpu.pipeline_mode<synchronous>, transform_indices = @transform_2, window_bounds = array<i64: 1, 128>}, {transform_indices = @transform_3, window_bounds = array<i64: 8, 128>}]} {
    %c0 = arith.constant 0 : index
    %c0_0 = arith.constant 0 : index
    %0 = vector.load %arg1[%c0, %c0_0] : memref<8x64xf32, #tpu.memory_space<vmem>>, vector<8x64xf32>
    %c0_1 = arith.constant 0 : index
    %c0_2 = arith.constant 0 : index
    %1 = vector.load %arg2[%c0_1, %c0_2] : memref<64x128xf32, #tpu.memory_space<vmem>>, vector<64x128xf32>
    %cst = arith.constant dense<0.000000e+00> : vector<8x128xf32>
    %2 = tpu.matmul %0, %1, %cst {dimension_numbers = #tpu.dot_dimension_numbers<[1], [0], [0], [1], [0, 0, 1, 1], [], []>} : vector<8x64xf32>, vector<64x128xf32>, vector<8x128xf32> -> vector<8x128xf32>
    %c0_3 = arith.constant 0 : index
    %c0_4 = arith.constant 0 : index
    %3 = vector.load %arg3[%c0_3, %c0_4] : memref<1x128xf32, #tpu.memory_space<vmem>>, vector<1x128xf32>
    %4 = vector.broadcast %3 : vector<1x128xf32> to vector<8x128xf32>
    %5 = arith.addf %2, %4 : vector<8x128xf32>
    %6 = vector.extract_strided_slice %0 {offsets = [0, 0], sizes = [8, 32], strides = [1, 1]} : vector<8x64xf32> to vector<8x32xf32>
    %7 = vector.extract_strided_slice %5 {offsets = [0, 0], sizes = [8, 64], strides = [1, 1]} : vector<8x128xf32> to vector<8x64xf32>
    %8 = vector.extract_strided_slice %7 {offsets = [0, 0], sizes = [8, 32], strides = [1, 1]} : vector<8x64xf32> to vector<8x32xf32>
    %9 = math.tanh %8 : vector<8x32xf32>
    %10 = vector.extract_strided_slice %7 {offsets = [0, 32], sizes = [8, 32], strides = [1, 1]} : vector<8x64xf32> to vector<8x32xf32>
    %11 = arith.negf %10 : vector<8x32xf32>
    %12 = math.exp %11 : vector<8x32xf32>
    %cst_5 = arith.constant 1.000000e+00 : f32
    %13 = vector.broadcast %cst_5 : f32 to vector<8x32xf32>
    %14 = arith.addf %13, %12 : vector<8x32xf32>
    %15 = arith.divf %13, %14 : vector<8x32xf32>
    %16 = arith.mulf %9, %15 : vector<8x32xf32>
    %17 = vector.extract_strided_slice %0 {offsets = [0, 32], sizes = [8, 32], strides = [1, 1]} : vector<8x64xf32> to vector<8x32xf32>
    %18 = vector.extract_strided_slice %5 {offsets = [0, 64], sizes = [8, 64], strides = [1, 1]} : vector<8x128xf32> to vector<8x64xf32>
    %19 = vector.extract_strided_slice %18 {offsets = [0, 0], sizes = [8, 32], strides = [1, 1]} : vector<8x64xf32> to vector<8x32xf32>
    %20 = math.tanh %19 : vector<8x32xf32>
    %21 = vector.extract_strided_slice %18 {offsets = [0, 32], sizes = [8, 32], strides = [1, 1]} : vector<8x64xf32> to vector<8x32xf32>
    %22 = arith.negf %21 : vector<8x32xf32>
    %23 = math.exp %22 : vector<8x32xf32>
    %cst_6 = arith.constant 1.000000e+00 : f32
    %24 = vector.broadcast %cst_6 : f32 to vector<8x32xf32>
    %25 = arith.addf %24, %23 : vector<8x32xf32>
    %26 = arith.divf %24, %25 : vector<8x32xf32>
    %27 = arith.mulf %20, %26 : vector<8x32xf32>
    %28 = tpu.concatenate %6, %16, %17, %27 in 1 : vector<8x32xf32>, vector<8x32xf32>, vector<8x32xf32>, vector<8x32xf32> -> vector<8x128xf32>
    %c0_7 = arith.constant 0 : index
    %c0_8 = arith.constant 0 : index
    %29 = vector.load %arg4[%c0_7, %c0_8] : memref<8x128xf32, #tpu.memory_space<vmem>>, vector<8x128xf32>
    tpu.vector_store %arg4[%c0_7, %c0_8], %28 {strides = array<i32>} : memref<8x128xf32, #tpu.memory_space<vmem>>, vector<8x128xf32>,
    return
  }
  func.func @transform_0(%arg0: i32) -> (i32, i32) {
    %c0_i32 = arith.constant 0 : i32
    %c0_i32_0 = arith.constant 0 : i32
    return %arg0, %c0_i32 : i32, i32
  }
  func.func @transform_1(%arg0: i32) -> (i32, i32) {
    %c0_i32 = arith.constant 0 : i32
    %c0_i32_0 = arith.constant 0 : i32
    %c0_i32_1 = arith.constant 0 : i32
    return %c0_i32, %c0_i32_0 : i32, i32
  }
  func.func @transform_2(%arg0: i32) -> (i32, i32) {
    %c0_i32 = arith.constant 0 : i32
    %c0_i32_0 = arith.constant 0 : i32
    %c0_i32_1 = arith.constant 0 : i32
    return %c0_i32, %c0_i32_0 : i32, i32
  }
  func.func @transform_3(%arg0: i32) -> (i32, i32) {
    %c0_i32 = arith.constant 0 : i32
    %c0_i32_0 = arith.constant 0 : i32
    return %arg0, %c0_i32 : i32, i32
  }
}

</mosaic_0001>

<bundles_post_ra>
// kernel: tpu_custom_call.1
= control target key start
LH: loop header
LB: loop body
LE: loop exit
PB: predicated region body
PF: predicated region fallthrough
CT: control target
= control target key end

     0   :  { %8 = vsyncpa [#allocation3], 0  ;;  %s388_s0 = inlined_call_operand.hbm [shape: f32[4,64], index: 0, kind: input, shape index: {}]   ;;  %s389_s1 = inlined_call_operand.hbm [shape: f32[64,128], index: 1, kind: input, shape index: {}]   ;;  %s390_s2 = inlined_call_operand.vmem [shape: f32[1,128], index: 2, kind: input, shape index: {}]   ;;  %s391_s3 = inlined_call_operand.hbm [shape: f32[4,128], index: 3, kind: output, shape index: {}]  }
   0x1   :  { %9 = vsyncpa [#allocation6], 0 }
   0x2   :  { %10 = vsyncpa [#allocation4], 0 }
   0x3   :  { %15 = vsyncadd [#allocation3], 64  ;;  %s309_s12 = smov [#allocation2]   ;;  %s237_s16 = scalar_lea.hbm %s388_s0, 64 }
   0x4   :  { %s16_s13 = sshll.u32 %s309_s12, 4  ;;  %p238_p0 = scmp.ne.s32.totalorder %s388_s0, %s237_s16  ;;  %s17_s13 = int_to_ptr.vmem [resolvable:$true] %s16_s13 }
   0x5   :  { %p241_p1 = scmp.lt.u32.totalorder %s237_s16, %s388_s0 }
   0x7   :  { %p243_p2 = pnand %p241_p1, %p238_p0 }
   0x9   :  { %246 = shalt.err (!%p243_p2)
}
   0xa   :  { %s247_s21 = scalar_lea.vmem %s17_s13, 64  ;;  %s251_s22 = scalar_lea.vmem %s17_s13, 128 }
   0xb   :  { %p248_p3 = scmp.ne.s32.totalorder %s17_s13, %s247_s21  ;;  %p252_p4 = scmp.lt.s32.totalorder %s17_s13, %s17_s13 }
   0xc   :  { %p253_p5 = scmp.lt.s32.totalorder %s251_s22, %s247_s21 }
   0xe   :  { %p254_p6 = por %p253_p5, %p252_p4 }
  0x10   :  { %p255_p7 = pnand %p254_p6, %p248_p3 }
  0x12   :  { %258 = shalt.err (!%p255_p7)
}
  0x13   :  { %s310_s23 = smov 64   ;;  %s311_s24 = smov 4  }
  0x14   :  { %22 = dma.hbm_to_vmem [thread:$0]  %s388_s0, 64, %s17_s13, [#allocation3], %s310_s23, %s310_s23, %s311_s24  }
  0x15   :  { %s312_s27 = smov [#allocation5]   ;;  %s259_s4 = scalar_lea.hbm %s389_s1, 1024 }
  0x16   :  { %s28_s28 = sshll.u32 %s312_s27, 4  ;;  %p260_p8 = scmp.ne.s32.totalorder %s389_s1, %s259_s4  ;;  %s29_s28 = int_to_ptr.vmem [resolvable:$true] %s28_s28 }
  0x17   :  { %p263_p9 = scmp.lt.u32.totalorder %s259_s4, %s389_s1 }
  0x19   :  { %p265_p10 = pnand %p263_p9, %p260_p8 }
  0x1b   :  { %268 = shalt.err (!%p265_p10)
}
  0x1c   :  { %s269_s9 = scalar_lea.vmem %s29_s28, 1024  ;;  %p274_p12 = scmp.lt.s32.totalorder %s29_s28, %s29_s28 }
  0x1d   :  { %p270_p11 = scmp.ne.s32.totalorder %s29_s28, %s269_s9  ;;  %p275_p13 = scmp.lt.s32.totalorder %s269_s9, %s269_s9 }
  0x1f   :  { %p276_p0 = por %p275_p13, %p274_p12 }
  0x21   :  { %p277_p1 = pnand %p276_p0, %p270_p11 }
  0x23   :  { %280 = shalt.err (!%p277_p1)
}
  0x24   :  { %s313_s0 = smov 128   ;;  %s314_s10 = smov 8  }
  0x25   :  { %34 = dma.hbm_to_vmem [thread:$0]  %s389_s1, 1024, %s29_s28, [#allocation6], %s313_s0, %s313_s0, %s314_s10  }
  0x26   :  { %303 = dma.done.wait [#allocation3], 128  }
  0x27   :  { %304 = vsyncadd [#allocation3], 4294967168 }
  0x28   :  { %305 = dma.done.wait [#allocation6], 1024  }
  0x29   :  { %306 = vsyncadd [#allocation6], 4294966272  ;;  %v315_v0 = vmov 0.0|0.0   ;;  %vm316_vm0 = vmmov 0   ;;  %v317_v1 = vmov 0.0   ;;  %v44_v2 = vld [vmem:[#allocation5] sm:$0xff] }
  0x2a   :  { %207 = vmatprep.subr.bf16.mxu0 %v315_v0  ;;  %204 = vmatprep.mubr.msk.f32.mxu0 %vm316_vm0, %v317_v1  ;;  %v45_v3 = vld [vmem:[#allocation5 + $0x8] sm:$0xff]  ;;  %v46_v4 = vld [vmem:[#allocation5 + $0x10] sm:$0xff]  ;;  %v47_v6 = vld [vmem:[#allocation5 + $0x18] sm:$0xff]  ;;  %vm59_vm1 = vcmask 523264   ;;  %s318_s14 = smov 32   ;;  %s319_s15 = smov 96  }
  0x2b   :  { %v208_v5 = vpack.c.bf16 %v45_v3, %v44_v2  ;;  %v211_v7 = vpack.c.bf16 %v47_v6, %v46_v4  ;;  %v48_v8 = vld [vmem:[#allocation5 + $0x20] sm:$0xff]  ;;  %v49_v9 = vld [vmem:[#allocation5 + $0x28] sm:$0xff]  ;;  %v50_v11 = vld [vmem:[#allocation5 + $0x30] sm:$0xff]  ;;  %vm152_vm2 = vcmask 261120   ;;  %vm155_vm3 = vcmask 785408  }
  0x2c   :  { %v214_v10 = vpack.c.bf16 %v49_v9, %v48_v8  ;;  %v51_v12 = vld [vmem:[#allocation5 + $0x38] sm:$0xff] }
  0x2d   :  { %209 = vmatpush3.bf16.msra.mxu0 %v208_v5  ;;  %v217_v13 = vpack.c.bf16 %v51_v12, %v50_v11  ;;  %v43_v14 = vld [vmem:[#allocation2] sm:$0xff] }
  0x2e   :  { %210 = vmatprep.subr.bf16.mxu0 %v315_v0  ;;  %v176_v15 = vld [vmem:[%s390_s2] ss:$0 sm:$0xff]  ;;  %149 = vrot.lane.b32.xlu1 %v43_v14, %s318_s14 }
  0x31   :  { %212 = vmatpush3.bf16.msra.mxu0 %v211_v7 }
  0x32   :  { %213 = vmatprep.subr.bf16.mxu0 %v315_v0 }
  0x35   :  { %215 = vmatpush3.bf16.msra.mxu0 %v214_v10 }
  0x36   :  { %216 = vmatprep.subr.bf16.mxu0 %v315_v0 }
  0x39   :  { %218 = vmatpush3.bf16.msra.mxu0 %v217_v13 }
  0x3c   :  { %205 = vmatmul.mubr.msk.f32.vlgmr.msra.gmra.mrb[0].mxu0 %vm59_vm1, %v43_v14 }
  0xa0   :  { %v150_v26 = vpop.permute.xlu1 %149 }
 0x10f   :  { %v129_v16 = vpop.f32.mrb[0].mxu0 }
 0x110   :  { %v130_v17 = vadd.f32 %v176_v15, %v129_v16  ;;  %v206_v18 = vpop.f32.mrb[1].mxu0 }
 0x112   :  { %v178_v19 = vmul.f32 -1.442695, %v130_v17 }
 0x114   :  { %231 = vpow2.f32 %v178_v19 }
 0x11e   :  { %v232_v20 = vpop.eup %231 }
 0x11f   :  { %v137_v21 = vadd.f32 1.0, %v232_v20 }
 0x121   :  { %233 = vrcp.f32 %v137_v21 }
 0x122   :  { %235 = vtanh.f32 %v130_v17 }
 0x12b   :  { %v234_v22 = vpop.eup %233 }
 0x12c   :  { %141 = vrot.lane.b32.xlu0 %v234_v22, %s319_s15  ;;  %v236_v23 = vpop.eup %235 }
 0x19e   :  { %v142_v24 = vpop.permute.xlu0 %141 }
 0x19f   :  { %v144_v25 = vmul.f32 %v236_v23, %v142_v24 }
 0x1a1   :  { %146 = vrot.lane.b32.xlu0 %v144_v25, %s318_s14 }
 0x213   :  { %v147_v27 = vpop.permute.xlu0 %146 }
 0x214   :  { %v153_v28 = vsel %vm152_vm2, %v43_v14, %v147_v27 }
 0x215   :  { %v154_v29 = vsel %vm59_vm1, %v153_v28, %v150_v26 }
 0x216   :  { %v156_v30 = vsel %vm155_vm3, %v154_v29, %v147_v27 }
 0x217   :  { %157 = vst [vmem:[#allocation7] sm:$0xff] %v156_v30 }
 0x218   :  { %162 = vsyncadd [#allocation4], 64  ;;  %s320_s2 = smov [#allocation7]  }
 0x219   :  { %s163_s16 = sshll.u32 %s320_s2, 4  ;;  %s164_s16 = int_to_ptr.vmem [resolvable:$true] %s163_s16 }
 0x21a   :  { %s281_s17 = scalar_lea.vmem %s164_s16, 64  ;;  %s285_s18 = scalar_lea.vmem %s164_s16, 128 }
 0x21b   :  { %p282_p2 = scmp.ne.s32.totalorder %s164_s16, %s281_s17  ;;  %p286_p3 = scmp.lt.s32.totalorder %s164_s16, %s164_s16 }
 0x21c   :  { %p287_p4 = scmp.lt.s32.totalorder %s285_s18, %s281_s17 }
 0x21e   :  { %p288_p5 = por %p287_p4, %p286_p3 }
 0x220   :  { %p289_p6 = pnand %p288_p5, %p282_p2 }
 0x222   :  { %292 = shalt.err (!%p289_p6)
}
 0x223   :  { %s293_s21 = scalar_lea.hbm %s391_s3, 64 }
 0x224   :  { %p294_p7 = scmp.ne.s32.totalorder %s391_s3, %s293_s21  ;;  %p297_p8 = scmp.lt.u32.totalorder %s293_s21, %s391_s3 }
 0x226   :  { %p299_p9 = pnand %p297_p8, %p294_p7 }
 0x228   :  { %302 = shalt.err (!%p299_p9)
}
 0x229   :  { %169 = dma.vmem_to_hbm [thread:$0]  %s164_s16, 64, %s391_s3, [#allocation4], %s310_s23, %s310_s23, %s311_s24  }
 0x22a   :  { %307 = dma.done.wait [#allocation4], 128  }
 0x22b   :  { %308 = vsyncadd [#allocation4], 4294967168 }
 0x22c   :  { %173 = vsyncpa [#allocation3], 1 }
 0x22d   :  { %174 = vsyncpa [#allocation6], 1 }
 0x22e   :  { %175 = vsyncpa [#allocation4], 1 }

</bundles_post_ra>
